<compile_context>
chip_gen: v6e
topology: v6e:2x2x1
jax: 0.10.0
libtpu: 0.0.40
codegen_flags: <defaults>
</compile_context>

<pallas_src>
import functools

import jax
import jax.numpy as jnp
from jax.experimental import pallas as pl
from jax.experimental.pallas import tpu as pltpu


def _mlp_kernel(q_ref, w1_ref, b1_ref, w2_ref, b2_ref, w3_ref, b3_ref, o_ref):
    # Fused 3-layer MLP hot path: two tanh hidden layers + final linear (MXU/VPU/EUP).
    x = q_ref[...].astype(jnp.float32)
    h = jnp.tanh(
        jnp.dot(x, w1_ref[...], preferred_element_type=jnp.float32) + b1_ref[...]
    )
    h = jnp.tanh(
        jnp.dot(h, w2_ref[...], preferred_element_type=jnp.float32) + b2_ref[...]
    )
    out = jnp.dot(h, w3_ref[...], preferred_element_type=jnp.float32) + b3_ref[...]
    o_ref[...] = out.astype(o_ref.dtype)


def _pick_batch_tile(batch, block_b):
    """Pick a TPU-legal batch tile: multiple of 8 (or the full batch), and leave
    >= 2 grid steps when the batch is large enough (v7x has 2 TensorCores)."""
    tb = min(block_b, batch)
    if batch > 8:
        # Cap at ~half the batch (rounded down to a multiple of 8) so the grid has
        # at least 2 steps to shard across TensorCores on v7x; harmless on v5e/v6e.
        half = max(8, ((batch // 2) // 8) * 8)
        tb = min(tb, half)
    if tb != batch:
        # (8,128) rule: second-to-last block dim must be a multiple of 8 unless it
        # equals the full array dim.  Partial last block is masked by Pallas.
        tb = max(8, (tb // 8) * 8)
    return tb


@functools.partial(jax.jit, static_argnames=("block_b", "out_dtype"))
def shared_mmv_embed(q, params, block_b=1024, out_dtype=None):
    """Forward pass of SharedMMVEmbed.

    q:      (B, qdim) float32
    params: dict with w1 (qdim,H1), b1 (1,H1), w2 (H1,H2), b2 (1,H2),
            w3 (H2,Hout), b3 (1,Hout)
    returns (B, Hout), dtype = out_dtype or q.dtype
    """
    B, qdim = q.shape
    w1, b1 = params["w1"], params["b1"]
    w2, b2 = params["w2"], params["b2"]
    w3, b3 = params["w3"], params["b3"]
    h1 = w1.shape[1]
    h2 = w2.shape[1]
    hout = w3.shape[1]
    out_dtype = q.dtype if out_dtype is None else out_dtype

    tb = _pick_batch_tile(B, block_b)
    grid = (pl.cdiv(B, tb),)

    # Parameters are grid-invariant: constant index_map keeps the same (small,
    # ~25 KB total) VMEM blocks across all grid steps.
    full = lambda shape: pl.BlockSpec(shape, lambda i: (0, 0))

    # Advisory cost hint so XLA overlaps this mem-bound call with neighbors.
    param_bytes = sum(int(p.size) * p.dtype.itemsize for p in (w1, b1, w2, b2, w3, b3))
    bytes_accessed = (
        B * qdim * q.dtype.itemsize
        + B * hout * jnp.dtype(out_dtype).itemsize
        + param_bytes
    )
    flops = 2 * B * (qdim * h1 + h1 * h2 + h2 * hout)
    transcendentals = B * (h1 + h2)

    return pl.pallas_call(
        _mlp_kernel,
        out_shape=jax.ShapeDtypeStruct((B, hout), out_dtype),
        grid_spec=pl.GridSpec(
            grid=grid,
            in_specs=[
                pl.BlockSpec((tb, qdim), lambda i: (i, 0)),  # q tile over batch
                full((qdim, h1)), full((1, h1)),
                full((h1, h2)), full((1, h2)),
                full((h2, hout)), full((1, hout)),
            ],
            out_specs=pl.BlockSpec((tb, hout), lambda i: (i, 0)),
        ),
        compiler_params=pltpu.CompilerParams(
            dimension_semantics=("parallel",),
        ),
        cost_estimate=pl.CostEstimate(
            flops=flops,
            transcendentals=transcendentals,
            bytes_accessed=bytes_accessed,
        ),
    )(q, w1, b1, w2, b2, w3, b3)


def init_params(key, qdim, hidden_sizes=(32, 32, 32)):
    """Deterministic synthetic init (shapes match LNMLP(qdim, hs[:-1], hs[-1]))."""
    h1, h2 = hidden_sizes[0], hidden_sizes[1]
    hout = hidden_sizes[-1]
    k1, k2, k3 = jax.random.split(key, 3)
    scale = 0.1
    params = {
        "w1": scale * jax.random.normal(k1, (qdim, h1), jnp.float32),
        "b1": jnp.zeros((1, h1), jnp.float32),
        "w2": scale * jax.random.normal(k2, (h1, h2), jnp.float32),
        "b2": jnp.zeros((1, h2), jnp.float32),
        "w3": scale * jax.random.normal(k3, (h2, hout), jnp.float32),
        "b3": jnp.zeros((1, hout), jnp.float32),
    }
    return params


def _reference(q, params):
    h = jnp.tanh(q @ params["w1"] + params["b1"])
    h = jnp.tanh(h @ params["w2"] + params["b2"])
    return h @ params["w3"] + params["b3"]


if __name__ == "__main__":
    key = jax.random.PRNGKey(0)
    kq, kp = jax.random.split(key)

    batch, qdim = 64, 4
    hidden_sizes = (32, 32, 32)

    q = jax.random.normal(kq, (batch, qdim), jnp.float32)
    params = init_params(kp, qdim, hidden_sizes)

    # Default path (large-tile logic exercises a 2-step grid even at this size).
    out = shared_mmv_embed(q, params)
    out = jax.block_until_ready(out)

    ref = _reference(q, params)
    assert out.shape == (batch, hidden_sizes[-1])
    assert jnp.allclose(out, ref, atol=1e-5, rtol=1e-5)

    # Also exercise a ragged (non-multiple-of-tile) batch to check masking.
    q2 = jax.random.normal(kq, (44, qdim), jnp.float32)
    out2 = jax.block_until_ready(shared_mmv_embed(q2, params, block_b=16))
    assert jnp.allclose(out2, _reference(q2, params), atol=1e-5, rtol=1e-5)

    print("KERNEL_OK")
</pallas_src>

<mosaic_0001>
module attributes {stable_mosaic.version = 11 : i64} {
  func.func @_mlp_kernel(%arg0: i32, %arg1: memref<32x4xf32, #tpu.memory_space<vmem>>, %arg2: memref<4x32xf32, #tpu.memory_space<vmem>>, %arg3: memref<1x32xf32, #tpu.memory_space<vmem>>, %arg4: memref<32x32xf32, #tpu.memory_space<vmem>>, %arg5: memref<1x32xf32, #tpu.memory_space<vmem>>, %arg6: memref<32x32xf32, #tpu.memory_space<vmem>>, %arg7: memref<1x32xf32, #tpu.memory_space<vmem>>, %arg8: memref<32x32xf32, #tpu.memory_space<vmem>>) attributes {dimension_semantics = [#tpu.dimension_semantics<parallel>], iteration_bounds = array<i64: 2>, scalar_prefetch = 0 : i64, scratch_operands = 0 : i64, tpu.core_type = #tpu.core_type<tc>, window_params = [{transform_indices = @transform_0, window_bounds = array<i64: 32, 4>}, {pipeline_mode = #tpu.pipeline_mode<synchronous>, transform_indices = @transform_1, window_bounds = array<i64: 4, 32>}, {pipeline_mode = #tpu.pipeline_mode<synchronous>, transform_indices = @transform_2, window_bounds = array<i64: 1, 32>}, {pipeline_mode = #tpu.pipeline_mode<synchronous>, transform_indices = @transform_3, window_bounds = array<i64: 32, 32>}, {pipeline_mode = #tpu.pipeline_mode<synchronous>, transform_indices = @transform_4, window_bounds = array<i64: 1, 32>}, {pipeline_mode = #tpu.pipeline_mode<synchronous>, transform_indices = @transform_5, window_bounds = array<i64: 32, 32>}, {pipeline_mode = #tpu.pipeline_mode<synchronous>, transform_indices = @transform_6, window_bounds = array<i64: 1, 32>}, {transform_indices = @transform_7, window_bounds = array<i64: 32, 32>}]} {
    %c0 = arith.constant 0 : index
    %c0_0 = arith.constant 0 : index
    %0 = vector.load %arg1[%c0, %c0_0] : memref<32x4xf32, #tpu.memory_space<vmem>>, vector<32x4xf32>
    %c0_1 = arith.constant 0 : index
    %c0_2 = arith.constant 0 : index
    %1 = vector.load %arg2[%c0_1, %c0_2] : memref<4x32xf32, #tpu.memory_space<vmem>>, vector<4x32xf32>
    %cst = arith.constant dense<0.000000e+00> : vector<32x32xf32>
    %2 = tpu.matmul %0, %1, %cst {dimension_numbers = #tpu.dot_dimension_numbers<[1], [0], [0], [1], [0, 0, 1, 1], [], []>} : vector<32x4xf32>, vector<4x32xf32>, vector<32x32xf32> -> vector<32x32xf32>
    %c0_3 = arith.constant 0 : index
    %c0_4 = arith.constant 0 : index
    %3 = vector.load %arg3[%c0_3, %c0_4] : memref<1x32xf32, #tpu.memory_space<vmem>>, vector<1x32xf32>
    %4 = vector.broadcast %3 : vector<1x32xf32> to vector<32x32xf32>
    %5 = arith.addf %2, %4 : vector<32x32xf32>
    %6 = math.tanh %5 : vector<32x32xf32>
    %c0_5 = arith.constant 0 : index
    %c0_6 = arith.constant 0 : index
    %7 = vector.load %arg4[%c0_5, %c0_6] : memref<32x32xf32, #tpu.memory_space<vmem>>, vector<32x32xf32>
    %cst_7 = arith.constant dense<0.000000e+00> : vector<32x32xf32>
    %8 = tpu.matmul %6, %7, %cst_7 {dimension_numbers = #tpu.dot_dimension_numbers<[1], [0], [0], [1], [0, 0, 1, 1], [], []>} : vector<32x32xf32>, vector<32x32xf32>, vector<32x32xf32> -> vector<32x32xf32>
    %c0_8 = arith.constant 0 : index
    %c0_9 = arith.constant 0 : index
    %9 = vector.load %arg5[%c0_8, %c0_9] : memref<1x32xf32, #tpu.memory_space<vmem>>, vector<1x32xf32>
    %10 = vector.broadcast %9 : vector<1x32xf32> to vector<32x32xf32>
    %11 = arith.addf %8, %10 : vector<32x32xf32>
    %12 = math.tanh %11 : vector<32x32xf32>
    %c0_10 = arith.constant 0 : index
    %c0_11 = arith.constant 0 : index
    %13 = vector.load %arg6[%c0_10, %c0_11] : memref<32x32xf32, #tpu.memory_space<vmem>>, vector<32x32xf32>
    %cst_12 = arith.constant dense<0.000000e+00> : vector<32x32xf32>
    %14 = tpu.matmul %12, %13, %cst_12 {dimension_numbers = #tpu.dot_dimension_numbers<[1], [0], [0], [1], [0, 0, 1, 1], [], []>} : vector<32x32xf32>, vector<32x32xf32>, vector<32x32xf32> -> vector<32x32xf32>
    %c0_13 = arith.constant 0 : index
    %c0_14 = arith.constant 0 : index
    %15 = vector.load %arg7[%c0_13, %c0_14] : memref<1x32xf32, #tpu.memory_space<vmem>>, vector<1x32xf32>
    %16 = vector.broadcast %15 : vector<1x32xf32> to vector<32x32xf32>
    %17 = arith.addf %14, %16 : vector<32x32xf32>
    %c0_15 = arith.constant 0 : index
    %c0_16 = arith.constant 0 : index
    %18 = vector.load %arg8[%c0_15, %c0_16] : memref<32x32xf32, #tpu.memory_space<vmem>>, vector<32x32xf32>
    tpu.vector_store %arg8[%c0_15, %c0_16], %17 {strides = array<i32>} : memref<32x32xf32, #tpu.memory_space<vmem>>, vector<32x32xf32>,
    return
  }
  func.func @transform_0(%arg0: i32) -> (i32, i32) {
    %c0_i32 = arith.constant 0 : i32
    %c0_i32_0 = arith.constant 0 : i32
    return %arg0, %c0_i32 : i32, i32
  }
  func.func @transform_1(%arg0: i32) -> (i32, i32) {
    %c0_i32 = arith.constant 0 : i32
    %c0_i32_0 = arith.constant 0 : i32
    %c0_i32_1 = arith.constant 0 : i32
    return %c0_i32, %c0_i32_0 : i32, i32
  }
  func.func @transform_2(%arg0: i32) -> (i32, i32) {
    %c0_i32 = arith.constant 0 : i32
    %c0_i32_0 = arith.constant 0 : i32
    %c0_i32_1 = arith.constant 0 : i32
    return %c0_i32, %c0_i32_0 : i32, i32
  }
  func.func @transform_3(%arg0: i32) -> (i32, i32) {
    %c0_i32 = arith.constant 0 : i32
    %c0_i32_0 = arith.constant 0 : i32
    %c0_i32_1 = arith.constant 0 : i32
    return %c0_i32, %c0_i32_0 : i32, i32
  }
  func.func @transform_4(%arg0: i32) -> (i32, i32) {
    %c0_i32 = arith.constant 0 : i32
    %c0_i32_0 = arith.constant 0 : i32
    %c0_i32_1 = arith.constant 0 : i32
    return %c0_i32, %c0_i32_0 : i32, i32
  }
  func.func @transform_5(%arg0: i32) -> (i32, i32) {
    %c0_i32 = arith.constant 0 : i32
    %c0_i32_0 = arith.constant 0 : i32
    %c0_i32_1 = arith.constant 0 : i32
    return %c0_i32, %c0_i32_0 : i32, i32
  }
  func.func @transform_6(%arg0: i32) -> (i32, i32) {
    %c0_i32 = arith.constant 0 : i32
    %c0_i32_0 = arith.constant 0 : i32
    %c0_i32_1 = arith.constant 0 : i32
    return %c0_i32, %c0_i32_0 : i32, i32
  }
  func.func @transform_7(%arg0: i32) -> (i32, i32) {
    %c0_i32 = arith.constant 0 : i32
    %c0_i32_0 = arith.constant 0 : i32
    return %arg0, %c0_i32 : i32, i32
  }
}

</mosaic_0001>

<bundles_post_ra>
// kernel: shared_mmv_embed.1
= control target key start
LH: loop header
LB: loop body
LE: loop exit
PB: predicated region body
PF: predicated region fallthrough
CT: control target
= control target key end

     0   :  { %s837_s24 = smov 0   ;;  %s909_s0 = inlined_call_operand.vmem [shape: f32[64,4], index: 0, kind: input, shape index: {}]   ;;  %s910_s1 = inlined_call_operand.vmem [shape: f32[4,32], index: 1, kind: input, shape index: {}]   ;;  %s911_s2 = inlined_call_operand.vmem [shape: f32[1,32], index: 2, kind: input, shape index: {}]   ;;  %s912_s3 = inlined_call_operand.vmem [shape: f32[32,32], index: 3, kind: input, shape index: {}]   ;;  %s913_s4 = inlined_call_operand.vmem [shape: f32[1,32], index: 4, kind: input, shape index: {}]   ;;  %s914_s5 = inlined_call_operand.vmem [shape: f32[32,32], index: 5, kind: input, shape index: {}]   ;;  %s915_s6 = inlined_call_operand.vmem [shape: f32[1,32], index: 6, kind: input, shape index: {}]   ;;  %s916_s7 = inlined_call_operand.vmem [shape: f32[64,32], index: 7, kind: output, shape index: {}]  }
   0x1 LB: > { %s681_s25 = sadd.s32 4294967295, %s795_s24   ;;  %p685_p0 = scmp.ge.s32.totalorder %s795_s24, 1  ;;  %s795_s24 = sphi %s837_s24, %s17_s24  }
   0x2   : > { %p238_p1 = scmp.lt.s32.totalorder %s795_s24, 3 }
   0x4   : > { %p239_p2 = pnand %p685_p0, %p238_p1 }
   0x5   : > { %s686_s28 = sshll.u32 (!%p239_p2), %s681_s25, 2 }
   0x6   : > { %242 = sbr.rel (%p239_p2) target bundleno = 642 (0x282), region = 48  ;;  %p271_p3 = scmp.lt.s32.totalorder (!%p239_p2), %s686_s28, 7 }
   0xb   : > { %v286_v0 = vld [vmem:[%s910_s1] sm:$0xf]  ;;  %vm307_vm0 = vcmask 1043456   ;;  %s918_s28 = smov (!%p271_p3, %s686_s28), 7  ;;  %vm294_vm1 = vcmask 31744   ;;  %v403_v5 = vld [vmem:[%s912_s3 + $0x18] sm:$0xff] }
   0xc   : > { %729 = vmatprep.subr.msk.mxu0 %vm307_vm0, %v286_v0  ;;  %s687_s29 = sshll.u32 %s918_s28, 3  ;;  %v402_v6 = vld [vmem:[%s912_s3 + $0x10] sm:$0xff]  ;;  %737 = vmatprep.subr.mxu1 %v403_v5  ;;  %v401_v7 = vld [vmem:[%s912_s3 + $0x8] sm:$0xff]  ;;  %v400_v8 = vld [vmem:[%s912_s3] sm:$0xff]  ;;  %vm411_vm2 = vcmask 261120  }
   0xd   : > { %730 = vmatpush3.msk.msra.mxu0 %vm307_vm0, %v286_v0  ;;  %s274_s9 = scalar_lea.vmem %s909_s0, %s687_s29  ;;  %738 = vmatpush3.msra.mxu1 %v403_v5  ;;  %v690_v9 = vld [vmem:[%s911_s2] ss:$0 sm:$0xff]  ;;  %v516_v22 = vld [vmem:[%s914_s5 + $0x18] sm:$0xff]  ;;  %v515_v23 = vld [vmem:[%s914_s5 + $0x10] sm:$0xff]  ;;  %s280_s14 = scalar_lea.vmem %s916_s7, %s687_s29 }
   0xe   : > { %v282_v1 = vld [vmem:[%s274_s9] sm:$0xff]  ;;  %v283_v2 = vld [vmem:[%s274_s9 + $0x8] sm:$0xff]  ;;  %v284_v3 = vld [vmem:[%s274_s9 + $0x10] sm:$0xff]  ;;  %739 = vmatprep.subr.mxu1 %v402_v6  ;;  %751 = vmatprep.subr.mxu0 %v516_v22 }
   0xf   : > { %731 = vmatprep.mubr.msk.f32.mxu0 %vm294_vm1, %v282_v1  ;;  %v285_v4 = vld [vmem:[%s274_s9 + $0x18] sm:$0xff]  ;;  %740 = vmatpush3.msra.mxu1 %v402_v6  ;;  %v514_v24 = vld [vmem:[%s914_s5 + $0x8] sm:$0xff]  ;;  %v513_v25 = vld [vmem:[%s914_s5] sm:$0xff] }
  0x10   : > { %732 = vmatmul.mubr.msk.f32.vlgmr.msra.gmra.mxu0 %vm294_vm1, %v283_v2  ;;  %741 = vmatprep.subr.mxu1 %v401_v7  ;;  %v696_v26 = vld [vmem:[%s913_s4] ss:$0 sm:$0xff] }
  0x11   : > { %734 = vmatprep.mubr.msk.f32.mxu0 %vm294_vm1, %v284_v3  ;;  %742 = vmatpush3.msra.mxu1 %v401_v7  ;;  %v701_v40 = vld [vmem:[%s915_s6] ss:$0 sm:$0xff] }
  0x12   : > { %743 = vmatprep.subr.mxu1 %v400_v8  ;;  %752 = vmatpush3.msra.mxu0 %v516_v22 }
  0x13   : > { %744 = vmatpush3.msra.mxu1 %v400_v8  ;;  %753 = vmatprep.subr.mxu0 %v515_v23 }
  0x14   : > { %735 = vmatmul.mubr.msk.f32.gmra.mxu0 %vm294_vm1, %v285_v4 }
  0x15   : > { %754 = vmatpush3.msra.mxu0 %v515_v23 }
  0x16   : > { %755 = vmatprep.subr.mxu0 %v514_v24 }
  0x17   : > { %756 = vmatpush3.msra.mxu0 %v514_v24 }
  0x18   : > { %757 = vmatprep.subr.mxu0 %v513_v25 }
  0x19   : > { %758 = vmatpush3.msra.mxu0 %v513_v25 }
  0xd0   : > { %v733_v10 = vpop.f32.mrf.mxu0 }
  0xd1   : > { %v383_v11 = vadd.f32 %v733_v10, %v690_v9 }
  0xd2   : > { %v377_v12 = vpop.f32.mrf.mxu0 }
  0xd3   : > { %v378_v13 = vadd.f32 %v690_v9, %v377_v12 }
  0xd4   : > { %v736_v14 = vpop.f32.mrf.mxu0 }
  0xd5   : > { %773 = vtanh.f32 %v378_v13  ;;  %v393_v15 = vadd.f32 %v736_v14, %v690_v9 }
  0xd6   : > { %775 = vtanh.f32 %v383_v11  ;;  %v387_v16 = vpop.f32.mrf.mxu0 }
  0xd7   : > { %v388_v17 = vadd.f32 %v690_v9, %v387_v16 }
  0xd9   : > { %777 = vtanh.f32 %v388_v17 }
  0xda   : > { %779 = vtanh.f32 %v393_v15 }
  0xe2   : > { %v774_v18 = vpop.eup %773 }
  0xe3   : > { %v776_v19 = vpop.eup %775  ;;  %745 = vmatprep.mubr.msk.f32.mxu1 %vm411_vm2, %v774_v18 }
  0xe4   : > { %746 = vmatmul.mubr.msk.f32.vlgmr.msra.gmra.mxu1 %vm411_vm2, %v776_v19 }
  0xe6   : > { %v778_v20 = vpop.eup %777 }
  0xe7   : > { %v780_v21 = vpop.eup %779  ;;  %748 = vmatprep.mubr.msk.f32.mxu1 %vm411_vm2, %v778_v20 }
  0xe8   : > { %749 = vmatmul.mubr.msk.f32.gmra.mxu1 %vm411_vm2, %v780_v21 }
 0x1a4   : > { %v747_v27 = vpop.f32.mrf.mxu1 }
 0x1a5   : > { %v496_v28 = vadd.f32 %v747_v27, %v696_v26 }
 0x1a6   : > { %v490_v29 = vpop.f32.mrf.mxu1 }
 0x1a7   : > { %v491_v30 = vadd.f32 %v696_v26, %v490_v29 }
 0x1a8   : > { %v750_v31 = vpop.f32.mrf.mxu1 }
 0x1a9   : > { %781 = vtanh.f32 %v491_v30  ;;  %v506_v32 = vadd.f32 %v750_v31, %v696_v26 }
 0x1aa   : > { %783 = vtanh.f32 %v496_v28  ;;  %v500_v33 = vpop.f32.mrf.mxu1 }
 0x1ab   : > { %v501_v34 = vadd.f32 %v696_v26, %v500_v33 }
 0x1ad   : > { %785 = vtanh.f32 %v501_v34 }
 0x1ae   : > { %787 = vtanh.f32 %v506_v32 }
 0x1b6   : > { %v782_v35 = vpop.eup %781 }
 0x1b7   : > { %v784_v36 = vpop.eup %783  ;;  %759 = vmatprep.mubr.msk.f32.mxu0 %vm411_vm2, %v782_v35 }
 0x1b8   : > { %760 = vmatmul.mubr.msk.f32.vlgmr.msra.gmra.mxu0 %vm411_vm2, %v784_v36 }
 0x1ba   : > { %v786_v37 = vpop.eup %785 }
 0x1bb   : > { %v788_v38 = vpop.eup %787  ;;  %762 = vmatprep.mubr.msk.f32.mxu0 %vm411_vm2, %v786_v37 }
 0x1bc   : > { %763 = vmatmul.mubr.msk.f32.gmra.mxu0 %vm411_vm2, %v788_v38 }
 0x278   : > { %v761_v39 = vpop.f32.mrf.mxu0 }
 0x279   : > { %v608_v43 = vadd.f32 %v761_v39, %v701_v40 }
 0x27a   : > { %v602_v41 = vpop.f32.mrf.mxu0 }
 0x27b   : > { %v603_v42 = vadd.f32 %v701_v40, %v602_v41  ;;  %622 = vst.msk [vmem:[%s280_s14 + $0x8] sm:$0xff] %vm411_vm2, %v608_v43 }
 0x27c   : > { %v764_v44 = vpop.f32.mrf.mxu0 }
 0x27d   : > { %621 = vst.msk [vmem:[%s280_s14] sm:$0xff] %vm411_vm2, %v603_v42  ;;  %v618_v47 = vadd.f32 %v764_v44, %v701_v40 }
 0x27e   : > { %v612_v45 = vpop.f32.mrf.mxu0 }
 0x27f   : > { %v613_v46 = vadd.f32 %v701_v40, %v612_v45  ;;  %624 = vst.msk [vmem:[%s280_s14 + $0x18] sm:$0xff] %vm411_vm2, %v618_v47 }
 0x281   : > { %623 = vst.msk [vmem:[%s280_s14 + $0x10] sm:$0xff] %vm411_vm2, %v613_v46 }
 0x282 PF: > { %s17_s24 = sadd.s32 1, %s795_s24  }
 0x283   : > { %p14_p4 = scmp.ge.s32.totalorder %s17_s24, 4  }
 0x285   :  { %16 = sbr.rel (!%p14_p4) target bundleno = 1 (0x1), region = 78 }

</bundles_post_ra>
